<compile_context>
chip_gen: v6e
topology: v6e:2x2x1
jax: 0.10.0
libtpu: 0.0.40
codegen_flags: <defaults>
</compile_context>

<pallas_src>
import functools

import jax
import jax.numpy as jnp
from jax import lax
from jax.experimental import pallas as pl
from jax.experimental.pallas import tpu as pltpu

_LANES = 128
_MAX_BLOCK_ROWS = 2048   # 2048 * 128 * 4 B = 1 MiB per f32 input block


def _sse_kernel(a_ref, b_ref, o_ref, acc_ref, *,
                block_rows, blocks_per_split, valid_rows, needs_mask):
    """Accumulates per-lane sums of squared differences for one split."""
    s = pl.program_id(0)          # split axis ("parallel", megacore shardable)
    i = pl.program_id(1)          # block axis ("arbitrary", reduction)

    @pl.when(i == 0)
    def _():
        acc_ref[...] = jnp.zeros_like(acc_ref)

    # Stream native dtype; do the arithmetic in f32 (avoids bf16 cancellation
    # loss and is required on v5e which has no bf16 VPU).
    d = a_ref[...].astype(jnp.float32) - b_ref[...].astype(jnp.float32)

    if needs_mask:
        # Global row index of every element in this block.  Zero rows that lie
        # past the real input (tail of the last block, or the duplicated
        # clamped block of the last split).  Mask BEFORE squaring so garbage
        # (possibly NaN/Inf) in the out-of-range region cannot poison the sum.
        g0 = (s * blocks_per_split + i) * block_rows
        row = lax.broadcasted_iota(jnp.int32, d.shape, 0) + g0
        d = jnp.where(row < valid_rows, d, 0.0)

    # Per-step sublane reduce into a tiny resident accumulator (VPU adds plus
    # one XLU reduce -- free filler under the HBM bound, and it keeps the
    # accumulator off the VMEM budget).
    acc_ref[...] += jnp.sum(d * d, axis=0, keepdims=True)

    @pl.when(i == pl.num_programs(1) - 1)
    def _():
        # Lane-dense (8, 128) partial-SSE output block for this split.
        o_ref[...] = jnp.zeros_like(o_ref)
        o_ref[0:1, :] = acc_ref[...]


def psnr(output, target, max_val=1.0):
    """PSNR between two arrays of identical shape (matches the PyTorch module)."""
    assert output.shape == target.shape
    n = output.size

    a = output.reshape(-1)
    b = target.reshape(-1)

    # Only pad when n is not lane-aligned (<128 extra elements).  Identical
    # zero padding of both inputs contributes 0 to the SSE and the mean below
    # divides by the true element count n.
    rem = n % _LANES
    if rem:
        a = jnp.pad(a, (0, _LANES - rem))
        b = jnp.pad(b, (0, _LANES - rem))
    rows = a.size // _LANES
    a = a.reshape(rows, _LANES)
    b = b.reshape(rows, _LANES)

    # Block is either the full row extent (always legal) or a multiple of 8.
    block_rows = rows if rows <= _MAX_BLOCK_ROWS else _MAX_BLOCK_ROWS
    total_blocks = pl.cdiv(rows, block_rows)

    # Shard the reduction across (up to) two TensorCores; no-op on 1-TC chips.
    num_splits = 2 if total_blocks >= 2 else 1
    blocks_per_split = pl.cdiv(total_blocks, num_splits)
    needs_mask = (rows % block_rows != 0) or (
        blocks_per_split * num_splits != total_blocks)

    def in_map(s, i):
        # Clamp so the (possibly) extra block of the last split stays in
        # bounds; its contribution is zeroed by the in-kernel row mask.
        return (jnp.minimum(s * blocks_per_split + i, total_blocks - 1), 0)

    kern = functools.partial(
        _sse_kernel,
        block_rows=block_rows,
        blocks_per_split=blocks_per_split,
        valid_rows=rows,
        needs_mask=needs_mask,
    )

    itemsize = jnp.dtype(output.dtype).itemsize
    partial_sse = pl.pallas_call(
        kern,
        out_shape=jax.ShapeDtypeStruct((num_splits * 8, _LANES), jnp.float32),
        grid=(num_splits, blocks_per_split),
        in_specs=[
            pl.BlockSpec((block_rows, _LANES), in_map),
            pl.BlockSpec((block_rows, _LANES), in_map),
        ],
        out_specs=pl.BlockSpec((8, _LANES), lambda s, i: (s, 0)),
        scratch_shapes=[pltpu.VMEM((1, _LANES), jnp.float32)],
        compiler_params=pltpu.CompilerParams(
            dimension_semantics=("parallel", "arbitrary")),
        cost_estimate=pl.CostEstimate(
            flops=3 * n,
            transcendentals=0,
            bytes_accessed=2 * n * itemsize + num_splits * 8 * _LANES * 4),
    )(a, b)

    # Tiny scalar finalize in the wrapper (negligible work).
    sse = jnp.sum(partial_sse)
    mse = sse / jnp.float32(n)
    return 20.0 * jnp.log10(jnp.float32(max_val) / jnp.sqrt(mse))


if __name__ == "__main__":
    key = jax.random.PRNGKey(0)
    k_out, k_tgt = jax.random.split(key)

    # Small image-like inputs consistent with the module (values in [0, 1),
    # max_val = 1.0), NCHW shape as in the PyTorch usage.
    output = jax.random.uniform(k_out, (2, 3, 16, 16), jnp.float32)
    target = jax.random.uniform(k_tgt, (2, 3, 16, 16), jnp.float32)

    psnr_fn = jax.jit(functools.partial(psnr, max_val=1.0))
    val = psnr_fn(output, target)
    jax.block_until_ready(val)

    # Pure-JAX reference check of the module's forward.
    mse_ref = jnp.mean((output - target) ** 2)
    ref = 20.0 * jnp.log10(1.0 / jnp.sqrt(mse_ref))

    assert val.shape == () and bool(jnp.isfinite(val))
    assert jnp.allclose(val, ref, rtol=1e-5, atol=1e-5), (val, ref)
    print("KERNEL_OK")
</pallas_src>

<mosaic_0001>
module attributes {stable_mosaic.version = 11 : i64} {
  func.func @_sse_kernel(%arg0: i32, %arg1: i32, %arg2: memref<12x128xf32, #tpu.memory_space<vmem>>, %arg3: memref<12x128xf32, #tpu.memory_space<vmem>>, %arg4: memref<8x128xf32, #tpu.memory_space<vmem>>, %arg5: memref<1x128xf32, #tpu.memory_space<vmem>>) attributes {dimension_semantics = [#tpu.dimension_semantics<parallel>, #tpu.dimension_semantics<arbitrary>], iteration_bounds = array<i64: 1, 1>, scalar_prefetch = 0 : i64, scratch_operands = 1 : i64, tpu.core_type = #tpu.core_type<tc>, window_params = [{transform_indices = @transform_0, window_bounds = array<i64: 12, 128>}, {transform_indices = @transform_1, window_bounds = array<i64: 12, 128>}, {transform_indices = @transform_2, window_bounds = array<i64: 8, 128>}]} {
    %c0_i32 = arith.constant 0 : i32
    %0 = arith.cmpi eq, %arg1, %c0_i32 : i32
    %1 = arith.extui %0 : i1 to i32
    %c0_i32_0 = arith.constant 0 : i32
    %2 = arith.cmpi ne, %1, %c0_i32_0 : i32
    scf.if %2 {
      %cst_10 = arith.constant 0.000000e+00 : f32
      %15 = vector.broadcast %cst_10 : f32 to vector<1x128xf32>
      %c0_11 = arith.constant 0 : index
      %c0_12 = arith.constant 0 : index
      %16 = vector.load %arg5[%c0_11, %c0_12] : memref<1x128xf32, #tpu.memory_space<vmem>>, vector<1x128xf32>
      tpu.vector_store %arg5[%c0_11, %c0_12], %15 {strides = array<i32>} : memref<1x128xf32, #tpu.memory_space<vmem>>, vector<1x128xf32>,
    } else {
    }
    %c0 = arith.constant 0 : index
    %c0_1 = arith.constant 0 : index
    %3 = vector.load %arg2[%c0, %c0_1] : memref<12x128xf32, #tpu.memory_space<vmem>>, vector<12x128xf32>
    %c0_2 = arith.constant 0 : index
    %c0_3 = arith.constant 0 : index
    %4 = vector.load %arg3[%c0_2, %c0_3] : memref<12x128xf32, #tpu.memory_space<vmem>>, vector<12x128xf32>
    %5 = arith.subf %3, %4 : vector<12x128xf32>
    %c0_4 = arith.constant 0 : index
    %c0_5 = arith.constant 0 : index
    %6 = vector.load %arg5[%c0_4, %c0_5] : memref<1x128xf32, #tpu.memory_space<vmem>>, vector<1x128xf32>
    %7 = arith.mulf %5, %5 : vector<12x128xf32>
    %cst = arith.constant dense<0.000000e+00> : vector<128xf32>
    %8 = vector.multi_reduction <add>, %7, %cst [0] : vector<12x128xf32> to vector<128xf32>
    %9 = vector.shape_cast %8 : vector<128xf32> to vector<1x128xf32>
    %10 = arith.addf %6, %9 : vector<1x128xf32>
    %c0_6 = arith.constant 0 : index
    %c0_7 = arith.constant 0 : index
    %11 = vector.load %arg5[%c0_6, %c0_7] : memref<1x128xf32, #tpu.memory_space<vmem>>, vector<1x128xf32>
    tpu.vector_store %arg5[%c0_6, %c0_7], %10 {strides = array<i32>} : memref<1x128xf32, #tpu.memory_space<vmem>>, vector<1x128xf32>,
    %c0_i32_8 = arith.constant 0 : i32
    %12 = arith.cmpi eq, %arg1, %c0_i32_8 : i32
    %13 = arith.extui %12 : i1 to i32
    %c0_i32_9 = arith.constant 0 : i32
    %14 = arith.cmpi ne, %13, %c0_i32_9 : i32
    scf.if %14 {
      %cst_10 = arith.constant 0.000000e+00 : f32
      %15 = vector.broadcast %cst_10 : f32 to vector<8x128xf32>
      %c0_11 = arith.constant 0 : index
      %c0_12 = arith.constant 0 : index
      %16 = vector.load %arg4[%c0_11, %c0_12] : memref<8x128xf32, #tpu.memory_space<vmem>>, vector<8x128xf32>
      tpu.vector_store %arg4[%c0_11, %c0_12], %15 {strides = array<i32>} : memref<8x128xf32, #tpu.memory_space<vmem>>, vector<8x128xf32>,
      %c0_13 = arith.constant 0 : index
      %c0_14 = arith.constant 0 : index
      %17 = vector.load %arg5[%c0_13, %c0_14] : memref<1x128xf32, #tpu.memory_space<vmem>>, vector<1x128xf32>
      %c0_15 = arith.constant 0 : index
      %c0_16 = arith.constant 0 : index
      %18 = vector.load %arg4[%c0_15, %c0_16] : memref<8x128xf32, #tpu.memory_space<vmem>>, vector<1x128xf32>
      tpu.vector_store %arg4[%c0_15, %c0_16], %17 {strides = array<i32>} : memref<8x128xf32, #tpu.memory_space<vmem>>, vector<1x128xf32>,
    } else {
    }
    return
  }
  func.func @transform_0(%arg0: i32, %arg1: i32) -> (i32, i32) {
    %c1_i32 = arith.constant 1 : i32
    %0 = arith.muli %arg0, %c1_i32 : i32
    %1 = arith.addi %0, %arg1 : i32
    %c0_i32 = arith.constant 0 : i32
    %2 = arith.minsi %1, %c0_i32 : i32
    %c0_i32_0 = arith.constant 0 : i32
    %c0_i32_1 = arith.constant 0 : i32
    return %2, %c0_i32_0 : i32, i32
  }
  func.func @transform_1(%arg0: i32, %arg1: i32) -> (i32, i32) {
    %c1_i32 = arith.constant 1 : i32
    %0 = arith.muli %arg0, %c1_i32 : i32
    %1 = arith.addi %0, %arg1 : i32
    %c0_i32 = arith.constant 0 : i32
    %2 = arith.minsi %1, %c0_i32 : i32
    %c0_i32_0 = arith.constant 0 : i32
    %c0_i32_1 = arith.constant 0 : i32
    return %2, %c0_i32_0 : i32, i32
  }
  func.func @transform_2(%arg0: i32, %arg1: i32) -> (i32, i32) {
    %c0_i32 = arith.constant 0 : i32
    %c0_i32_0 = arith.constant 0 : i32
    return %arg0, %c0_i32 : i32, i32
  }
}

</mosaic_0001>

<bundles_post_ra>
// kernel: psnr.1
= control target key start
LH: loop header
LB: loop body
LE: loop exit
PB: predicated region body
PF: predicated region fallthrough
CT: control target
= control target key end

     0   :  { %v123_v0 = vmov 0.0   ;;  %vm89_vm0 = vcmask 1043456   ;;  %s157_s0 = inlined_call_operand.vmem [shape: f32[12,128], index: 0, kind: input, shape index: {}]   ;;  %s158_s1 = inlined_call_operand.vmem [shape: f32[12,128], index: 1, kind: input, shape index: {}]   ;;  %s159_s2 = inlined_call_operand.vmem [shape: f32[8,128], index: 2, kind: output, shape index: {}]  }
   0x1   :  { %79 = vst [vmem:[#allocation2] sm:$0x1] %v123_v0  ;;  %v80_v1 = vld [vmem:[%s157_s0] sm:$0xff]  ;;  %v81_v2 = vld [vmem:[%s157_s0 + $0x8] sm:$0xf]  ;;  %103 = vst [vmem:[%s159_s2] sm:$0xff] %v123_v0 }
   0x2   :  { %v82_v3 = vld [vmem:[%s158_s1] sm:$0xff]  ;;  %v83_v4 = vld [vmem:[%s158_s1 + $0x8] sm:$0xf] }
   0x3   :  { %v84_v5 = vsub.f32 %v80_v1, %v82_v3  ;;  %v85_v6 = vsub.f32 %v81_v2, %v83_v4 }
   0x5   :  { %v87_v7 = vmul.f32 %v84_v5, %v84_v5  ;;  %v88_v8 = vmul.f32 %v85_v6, %v85_v6 }
   0x7   :  { %v90_v9 = vsel %vm89_vm0, %v88_v8, 0.0 }
   0x8   :  { %v91_v10 = vadd.f32 %v90_v9, %v87_v7  ;;  %v86_v16 = vld [vmem:[#allocation2] sm:$0x1] }
   0xa   :  { %v92_v11 = vrot.slane %v91_v10, 4 }
   0xc   :  { %v93_v12 = vadd.f32 %v92_v11, %v91_v10 }
   0xe   :  { %v94_v13 = vrot.slane %v93_v12, 2 }
  0x10   :  { %v95_v14 = vadd.f32 %v94_v13, %v93_v12 }
  0x12   :  { %v96_v15 = vrot.slane %v95_v14, 1 }
  0x14   :  { %v97_v17 = vadd.f32 %v96_v15, %v95_v14 }
  0x16   :  { %v98_v18 = vadd.f32 %v97_v17, %v86_v16 }
  0x18   :  { %99 = vst [vmem:[#allocation2] sm:$0x1] %v98_v18 }
  0x1f   :  { %v104_v19 = vld [vmem:[#allocation2] sm:$0x1] }
  0x20   :  { %105 = vst [vmem:[%s159_s2] sm:$0x1] %v104_v19 }

</bundles_post_ra>
